<compile_context>
chip_gen: v6e
topology: v6e:2x2x1
jax: 0.10.0
libtpu: 0.0.40
codegen_flags: <defaults>
</compile_context>

<pallas_src>
import jax
import jax.numpy as jnp
from jax.experimental import pallas as pl
from jax.experimental.pallas import tpu as pltpu


def _round_up(x, m):
    return ((x + m - 1) // m) * m


def _pick_batch_tile(batch, n_patches, target_rows=512, max_tile=8):
    """Images per grid step: ~target_rows matmul rows per step, must divide
    batch, and leave >= 2 grid steps so v7x's two TensorCores both get work."""
    tb = max(1, min(batch, max_tile, target_rows // max(1, n_patches)))
    while batch % tb:
        tb -= 1
    if batch > 1 and batch // tb < 2:
        tb = max(1, batch // 2)
        while batch % tb:
            tb -= 1
    return tb


def embedding_kernel(patch_ref, w_ref, pos_ref, cls_ref, bias_ref, out_ref):
    """One grid step = TB images.

    patch_ref: (TB, N, Kp)     bf16  flattened patches
    w_ref:     (Kp, Dp)        bf16  flattened conv weight (OIHW -> (K, D))
    pos_ref:   (TBp, N+1, Dp)  f32   positional embedding (TBp==1 if broadcast)
    cls_ref:   (TBc, 1, Dp)    f32   class token          (TBc==1 if broadcast)
    bias_ref:  (1, 1, Dp)      f32   conv bias (patch rows only)
    out_ref:   (TB, N+1, Dp)
    """
    tb, n, _ = patch_ref.shape
    tb_pos = pos_ref.shape[0]
    tb_cls = cls_ref.shape[0]
    w = w_ref[...]
    bias = bias_ref[0]                                        # (1, Dp) f32
    for i in range(tb):                                       # static unroll (tb small)
        ip = i if tb_pos > 1 else 0
        ic = i if tb_cls > 1 else 0
        # MXU: bf16 operands, f32 accumulation.
        acc = jnp.dot(patch_ref[i], w, preferred_element_type=jnp.float32)  # (N, Dp)
        out_ref[i, pl.ds(1, n), :] = (
            acc + bias + pos_ref[ip, pl.ds(1, n), :]).astype(out_ref.dtype)
        out_ref[i, pl.ds(0, 1), :] = (
            cls_ref[ic] + pos_ref[ip, pl.ds(0, 1), :]).astype(out_ref.dtype)


def embedding_forward(x, conv_w, conv_b, class_token, pos_emb, patch_size,
                      out_dtype=jnp.float32):
    """x: (B, C, H, W) NCHW. class_token: (1|B, 1, D). pos_emb: (1|B, N+1, D).
    Returns (B, N+1, D) in out_dtype."""
    B, C, H, W = x.shape
    P = patch_size
    assert H % P == 0 and W % P == 0
    Hp, Wp = H // P, W // P
    N = Hp * Wp
    D = conv_w.shape[0]
    K = C * P * P
    if class_token.shape[0] not in (1, B) or pos_emb.shape[0] not in (1, B):
        raise ValueError("class_token / pos_emb batch dim must be 1 or B")

    Kp = _round_up(K, 128)                 # aligned contraction dim (clean MXU feed)
    Dp = _round_up(D, 128)                 # lane-dense output (unmasked vst)
    TB = _pick_batch_tile(B, N)

    # ---- glue (plain JAX): patch extraction + weight flatten ---------------
    # Flatten order (c, kh, kw) matches the OIHW conv-weight flatten.
    # Cast to bf16 first so the transpose moves half the bytes.
    # TODO(synk): for large images store activations NHWC upstream so this
    # transpose does not add a full extra HBM pass over x.
    patches = (x.astype(jnp.bfloat16)
                 .reshape(B, C, Hp, P, Wp, P)
                 .transpose(0, 2, 4, 1, 3, 5)                 # (B, Hp, Wp, C, P, P)
                 .reshape(B, N, K))
    if Kp != K:
        patches = jnp.pad(patches, ((0, 0), (0, 0), (0, Kp - K)))

    w = conv_w.reshape(D, K).T.astype(jnp.bfloat16)           # (K, D)
    if (Kp, Dp) != (K, D):
        w = jnp.pad(w, ((0, Kp - K), (0, Dp - D)))

    def pad_d(a):
        if a.shape[-1] == Dp:
            return a
        return jnp.pad(a, ((0, 0),) * (a.ndim - 1) + ((0, Dp - D),))

    pos = pad_d(pos_emb.astype(jnp.float32))                  # (1|B, N+1, Dp)
    cls = pad_d(class_token.astype(jnp.float32))              # (1|B, 1,   Dp)
    bias = pad_d(conv_b.astype(jnp.float32).reshape(1, 1, D))  # (1, 1, Dp)

    pos_bcast = pos.shape[0] == 1
    cls_bcast = cls.shape[0] == 1
    tb_pos = 1 if pos_bcast else TB
    tb_cls = 1 if cls_bcast else TB
    pos_map = (lambda b: (0, 0, 0)) if pos_bcast else (lambda b: (b, 0, 0))
    cls_map = (lambda b: (0, 0, 0)) if cls_bcast else (lambda b: (b, 0, 0))

    # VMEM guard: v7x has 64 MiB physical (32 MiB default scoped) vs 128 MiB on
    # v5e/v6e.  Only raise the limit when the double-buffered set needs it.
    # TODO(synk): for very large D on v7x, add a D grid axis (tile Dp) and
    # single-buffer the constant weight block instead of only raising the limit.
    out_isz = jnp.dtype(out_dtype).itemsize
    block_bytes = (TB * N * Kp * 2 + Kp * Dp * 2
                   + tb_pos * (N + 1) * Dp * 4 + tb_cls * Dp * 4 + Dp * 4
                   + TB * (N + 1) * Dp * out_isz)
    vmem_need = 2 * block_bytes + (1 << 20)
    vmem_limit = None if vmem_need <= (16 << 20) else min(vmem_need, 64 << 20)

    out_p = pl.pallas_call(
        embedding_kernel,
        out_shape=jax.ShapeDtypeStruct((B, N + 1, Dp), out_dtype),
        grid_spec=pltpu.PrefetchScalarGridSpec(
            num_scalar_prefetch=0,
            grid=(B // TB,),
            in_specs=[
                pl.BlockSpec((TB, N, Kp), lambda b: (b, 0, 0)),   # patches
                pl.BlockSpec((Kp, Dp), lambda b: (0, 0)),         # conv weight
                pl.BlockSpec((tb_pos, N + 1, Dp), pos_map),       # pos embedding
                pl.BlockSpec((tb_cls, 1, Dp), cls_map),           # class token
                pl.BlockSpec((1, 1, Dp), lambda b: (0, 0, 0)),    # conv bias
            ],
            out_specs=pl.BlockSpec((TB, N + 1, Dp), lambda b: (b, 0, 0)),
        ),
        compiler_params=pltpu.CompilerParams(
            dimension_semantics=("parallel",),
            vmem_limit_bytes=vmem_limit),
    )(patches, w, pos, cls, bias)

    # TODO(synk): optional fp8 patches/weight on v7x (MXU-native fp8) would
    # halve the patch input stream; needs per-model accuracy validation.
    return out_p if Dp == D else out_p[..., :D]


def reference_forward(x, conv_w, conv_b, class_token, pos_emb, patch_size):
    """Pure-JAX reference (mirrors the PyTorch forward)."""
    y = jax.lax.conv_general_dilated(
        x, conv_w,
        window_strides=(patch_size, patch_size),
        padding="VALID",
        dimension_numbers=("NCHW", "OIHW", "NCHW"))
    y = y + conv_b.reshape(1, -1, 1, 1)
    B, D, Hp, Wp = y.shape
    y = y.reshape(B, D, Hp * Wp).transpose(0, 2, 1)           # (B, N, D)
    y = jnp.concatenate([class_token, y], axis=1)             # (B, N+1, D)
    return pos_emb + y


if __name__ == "__main__":
    # Small, module-consistent shapes.
    batch_size = 2
    num_channels = 3
    image_size = 16
    patch_size = 4
    embedding_dim = 32
    num_patches = (image_size // patch_size) ** 2             # 16

    key = jax.random.PRNGKey(0)
    kx, kw, kb, kc, kp = jax.random.split(key, 5)

    x = jax.random.normal(kx, (batch_size, num_channels, image_size, image_size),
                          dtype=jnp.float32)
    # Conv2d(num_channels -> embedding_dim, kernel=stride=patch_size) params.
    fan_in = num_channels * patch_size * patch_size
    bound = 1.0 / jnp.sqrt(fan_in)
    conv_w = jax.random.uniform(kw, (embedding_dim, num_channels, patch_size, patch_size),
                                minval=-bound, maxval=bound, dtype=jnp.float32)
    conv_b = jax.random.uniform(kb, (embedding_dim,),
                                minval=-bound, maxval=bound, dtype=jnp.float32)
    class_token = jax.random.normal(kc, (batch_size, 1, embedding_dim), dtype=jnp.float32)
    pos_emb = jax.random.normal(kp, (batch_size, num_patches + 1, embedding_dim),
                                dtype=jnp.float32)

    # 1) Per-batch class token / pos embedding (exactly the PyTorch module's shapes).
    out = embedding_forward(x, conv_w, conv_b, class_token, pos_emb, patch_size)
    out = jax.block_until_ready(out)
    ref = reference_forward(x, conv_w, conv_b, class_token, pos_emb, patch_size)
    assert out.shape == (batch_size, num_patches + 1, embedding_dim)
    # bf16 MXU operands with f32 accumulation: well within 1e-2 of the f32 ref.
    assert jnp.allclose(out, ref, atol=1e-2, rtol=1e-2)

    # 2) Batch-broadcast (1, N+1, D) parameters (the usual ViT layout) — the
    #    kernel reads them once per grid step instead of duplicating per image.
    out_b = embedding_forward(x, conv_w, conv_b, class_token[:1], pos_emb[:1], patch_size)
    out_b = jax.block_until_ready(out_b)
    ref_b = reference_forward(
        x, conv_w, conv_b,
        jnp.broadcast_to(class_token[:1], class_token.shape),
        jnp.broadcast_to(pos_emb[:1], pos_emb.shape), patch_size)
    assert jnp.allclose(out_b, ref_b, atol=1e-2, rtol=1e-2)

    print("KERNEL_OK")
</pallas_src>

<mosaic_0001>
module attributes {stable_mosaic.version = 11 : i64} {
  func.func @embedding_kernel(%arg0: i32, %arg1: memref<1x16x128xbf16, #tpu.memory_space<vmem>>, %arg2: memref<128x128xbf16, #tpu.memory_space<vmem>>, %arg3: memref<1x17x128xf32, #tpu.memory_space<vmem>>, %arg4: memref<1x1x128xf32, #tpu.memory_space<vmem>>, %arg5: memref<1x1x128xf32, #tpu.memory_space<vmem>>, %arg6: memref<1x17x128xf32, #tpu.memory_space<vmem>>) attributes {dimension_semantics = [#tpu.dimension_semantics<parallel>], iteration_bounds = array<i64: 2>, scalar_prefetch = 0 : i64, scratch_operands = 0 : i64, tpu.core_type = #tpu.core_type<tc>, window_params = [{transform_indices = @transform_0, window_bounds = array<i64: 1, 16, 128>}, {pipeline_mode = #tpu.pipeline_mode<synchronous>, transform_indices = @transform_1, window_bounds = array<i64: 128, 128>}, {transform_indices = @transform_2, window_bounds = array<i64: 1, 17, 128>}, {transform_indices = @transform_3, window_bounds = array<i64: 1, 1, 128>}, {pipeline_mode = #tpu.pipeline_mode<synchronous>, transform_indices = @transform_4, window_bounds = array<i64: 1, 1, 128>}, {transform_indices = @transform_5, window_bounds = array<i64: 1, 17, 128>}]} {
    %c0 = arith.constant 0 : index
    %c0_0 = arith.constant 0 : index
    %0 = vector.load %arg2[%c0, %c0_0] : memref<128x128xbf16, #tpu.memory_space<vmem>>, vector<128x128xbf16>
    %c0_1 = arith.constant 0 : index
    %c0_2 = arith.constant 0 : index
    %c0_3 = arith.constant 0 : index
    %1 = vector.load %arg5[%c0_1, %c0_2, %c0_3] : memref<1x1x128xf32, #tpu.memory_space<vmem>>, vector<1x1x128xf32>
    %2 = vector.shape_cast %1 : vector<1x1x128xf32> to vector<1x128xf32>
    %c0_4 = arith.constant 0 : index
    %c0_5 = arith.constant 0 : index
    %c0_6 = arith.constant 0 : index
    %3 = vector.load %arg1[%c0_4, %c0_5, %c0_6] : memref<1x16x128xbf16, #tpu.memory_space<vmem>>, vector<1x16x128xbf16>
    %4 = vector.shape_cast %3 : vector<1x16x128xbf16> to vector<16x128xbf16>
    %cst = arith.constant dense<0.000000e+00> : vector<16x128xf32>
    %5 = tpu.matmul %4, %0, %cst {dimension_numbers = #tpu.dot_dimension_numbers<[1], [0], [0], [1], [0, 0, 1, 1], [], []>} : vector<16x128xbf16>, vector<128x128xbf16>, vector<16x128xf32> -> vector<16x128xf32>
    %6 = vector.broadcast %2 : vector<1x128xf32> to vector<16x128xf32>
    %7 = arith.addf %5, %6 : vector<16x128xf32>
    %c0_7 = arith.constant 0 : index
    %c1 = arith.constant 1 : index
    %c0_8 = arith.constant 0 : index
    %8 = vector.load %arg3[%c0_7, %c1, %c0_8] : memref<1x17x128xf32, #tpu.memory_space<vmem>>, vector<1x16x128xf32>
    %9 = vector.shape_cast %8 : vector<1x16x128xf32> to vector<16x128xf32>
    %10 = arith.addf %7, %9 : vector<16x128xf32>
    %c0_9 = arith.constant 0 : index
    %c1_10 = arith.constant 1 : index
    %c0_11 = arith.constant 0 : index
    %11 = vector.load %arg6[%c0_9, %c1_10, %c0_11] : memref<1x17x128xf32, #tpu.memory_space<vmem>>, vector<1x16x128xf32>
    %12 = vector.shape_cast %11 : vector<1x16x128xf32> to vector<16x128xf32>
    %13 = vector.shape_cast %10 : vector<16x128xf32> to vector<1x16x128xf32>
    tpu.vector_store %arg6[%c0_9, %c1_10, %c0_11], %13 {strides = array<i32>} : memref<1x17x128xf32, #tpu.memory_space<vmem>>, vector<1x16x128xf32>,
    %c0_12 = arith.constant 0 : index
    %c0_13 = arith.constant 0 : index
    %c0_14 = arith.constant 0 : index
    %14 = vector.load %arg4[%c0_12, %c0_13, %c0_14] : memref<1x1x128xf32, #tpu.memory_space<vmem>>, vector<1x1x128xf32>
    %15 = vector.shape_cast %14 : vector<1x1x128xf32> to vector<1x128xf32>
    %c0_15 = arith.constant 0 : index
    %c0_16 = arith.constant 0 : index
    %c0_17 = arith.constant 0 : index
    %16 = vector.load %arg3[%c0_15, %c0_16, %c0_17] : memref<1x17x128xf32, #tpu.memory_space<vmem>>, vector<1x1x128xf32>
    %17 = vector.shape_cast %16 : vector<1x1x128xf32> to vector<1x128xf32>
    %18 = arith.addf %15, %17 : vector<1x128xf32>
    %c0_18 = arith.constant 0 : index
    %c0_19 = arith.constant 0 : index
    %c0_20 = arith.constant 0 : index
    %19 = vector.load %arg6[%c0_18, %c0_19, %c0_20] : memref<1x17x128xf32, #tpu.memory_space<vmem>>, vector<1x1x128xf32>
    %20 = vector.shape_cast %19 : vector<1x1x128xf32> to vector<1x128xf32>
    %21 = vector.shape_cast %18 : vector<1x128xf32> to vector<1x1x128xf32>
    tpu.vector_store %arg6[%c0_18, %c0_19, %c0_20], %21 {strides = array<i32>} : memref<1x17x128xf32, #tpu.memory_space<vmem>>, vector<1x1x128xf32>,
    return
  }
  func.func @transform_0(%arg0: i32) -> (i32, i32, i32) {
    %c0_i32 = arith.constant 0 : i32
    %c0_i32_0 = arith.constant 0 : i32
    %c0_i32_1 = arith.constant 0 : i32
    return %arg0, %c0_i32, %c0_i32_0 : i32, i32, i32
  }
  func.func @transform_1(%arg0: i32) -> (i32, i32) {
    %c0_i32 = arith.constant 0 : i32
    %c0_i32_0 = arith.constant 0 : i32
    %c0_i32_1 = arith.constant 0 : i32
    return %c0_i32, %c0_i32_0 : i32, i32
  }
  func.func @transform_2(%arg0: i32) -> (i32, i32, i32) {
    %c0_i32 = arith.constant 0 : i32
    %c0_i32_0 = arith.constant 0 : i32
    %c0_i32_1 = arith.constant 0 : i32
    return %arg0, %c0_i32, %c0_i32_0 : i32, i32, i32
  }
  func.func @transform_3(%arg0: i32) -> (i32, i32, i32) {
    %c0_i32 = arith.constant 0 : i32
    %c0_i32_0 = arith.constant 0 : i32
    %c0_i32_1 = arith.constant 0 : i32
    return %arg0, %c0_i32, %c0_i32_0 : i32, i32, i32
  }
  func.func @transform_4(%arg0: i32) -> (i32, i32, i32) {
    %c0_i32 = arith.constant 0 : i32
    %c0_i32_0 = arith.constant 0 : i32
    %c0_i32_1 = arith.constant 0 : i32
    %c0_i32_2 = arith.constant 0 : i32
    return %c0_i32, %c0_i32_0, %c0_i32_1 : i32, i32, i32
  }
  func.func @transform_5(%arg0: i32) -> (i32, i32, i32) {
    %c0_i32 = arith.constant 0 : i32
    %c0_i32_0 = arith.constant 0 : i32
    %c0_i32_1 = arith.constant 0 : i32
    return %arg0, %c0_i32, %c0_i32_0 : i32, i32, i32
  }
}

</mosaic_0001>

<bundles_post_ra>
// kernel: tpu_custom_call.1
= control target key start
LH: loop header
LB: loop body
LE: loop exit
PB: predicated region body
PF: predicated region fallthrough
CT: control target
= control target key end

     0   :  { %s577_s18 = smov 0   ;;  %s632_s0 = inlined_call_operand.vmem [shape: bf16[2,16,128], index: 0, kind: input, shape index: {}]   ;;  %s633_s1 = inlined_call_operand.vmem [shape: bf16[128,128], index: 1, kind: input, shape index: {}]   ;;  %s634_s2 = inlined_call_operand.vmem [shape: f32[2,17,128], index: 2, kind: input, shape index: {}]   ;;  %s635_s3 = inlined_call_operand.vmem [shape: f32[2,1,128], index: 3, kind: input, shape index: {}]   ;;  %s636_s4 = inlined_call_operand.vmem [shape: f32[1,1,128], index: 4, kind: input, shape index: {}]   ;;  %s637_s5 = inlined_call_operand.vmem [shape: f32[2,17,128], index: 5, kind: output, shape index: {}]  }
   0x1 LB: > { %s466_s19 = sadd.s32 4294967295, %s543_s18   ;;  %p470_p0 = scmp.ge.s32.totalorder %s543_s18, 1  ;;  %s543_s18 = sphi %s577_s18, %s15_s18  }
   0x2   : > { %p205_p1 = scmp.lt.s32.totalorder %s543_s18, 3 }
   0x4   : > { %p206_p2 = pnand %p470_p0, %p205_p1 }
   0x5   : > { %p241_p3 = scmp.lt.s32.totalorder (!%p206_p2), %s466_s19, 1 }
   0x6   : > { %209 = sbr.rel (%p206_p2) target bundleno = 246 (0xf6), region = 40 }
   0xb   : > { %v528_v0 = vld [vmem:[%s633_s1 + $0x38] sm:$0xff]   ;;  %v545_v1 = vmov 0.0   ;;  %v529_v2 = vld [vmem:[%s633_s1 + $0x30] sm:$0xff]   ;;  %vm546_vm0 = vmmov 0   ;;  %s639_s19 = smov (!%p241_p3, %s466_s19), 1  ;;  %v530_v3 = vld [vmem:[%s633_s1 + $0x28] sm:$0xff]  }
   0xc   : > { %497 = vmatprep.subr.bf16.mxu0 %v545_v1  ;;  %513 = vmatprep.mubr.msk.bf16.mxu0 %vm546_vm0, %v545_v1  ;;  %s487_s26 = sshll.u32 %s639_s19, 3  ;;  %v531_v4 = vld [vmem:[%s633_s1 + $0x20] sm:$0xff]   ;;  %v532_v5 = vld [vmem:[%s633_s1 + $0x18] sm:$0xff]   ;;  %v533_v6 = vld [vmem:[%s633_s1 + $0x10] sm:$0xff]   ;;  %s517_s15 = smul.u32 24, %s639_s19 }
   0xd   : > { %498 = vmatpush3.bf16.msra.mxu0 %v528_v0  ;;  %s245_s29 = scalar_lea.vmem %s632_s0, %s487_s26  ;;  %v534_v7 = vld [vmem:[%s633_s1 + $0x8] sm:$0xff]   ;;  %v535_v8 = vld [vmem:[%s633_s1] sm:$0xff]   ;;  %s253_s20 = scalar_lea.vmem %s635_s3, %s639_s19 }
   0xe   : > { %499 = vmatprep.subr.bf16.mxu0 %v545_v1  ;;  %v536_v9 = vld [vmem:[%s245_s29] sm:$0xff]   ;;  %s250_s23 = scalar_lea.vmem %s634_s2, %s517_s15  ;;  %s258_s26 = scalar_lea.vmem %s637_s5, %s517_s15 }
   0xf   : > { %v386_v10 = vld [vmem:[%s253_s20] sm:$0x1]  ;;  %v380_v15 = vld [vmem:[%s250_s23 + $0x1] sm:$0xff]  ;;  %v381_v20 = vld [vmem:[%s250_s23 + $0x9] sm:$0xff] }
  0x10   : > { %v387_v11 = vld [vmem:[%s250_s23] sm:$0x1] }
  0x11   : > { %500 = vmatpush3.bf16.msra.mxu0 %v529_v2  ;;  %v388_v12 = vadd.f32 %v387_v11, %v386_v10  ;;  %v475_v13 = vld [vmem:[%s636_s4] ss:$0 sm:$0xff] }
  0x12   : > { %501 = vmatprep.subr.bf16.mxu0 %v545_v1 }
  0x13   : > { %389 = vst [vmem:[%s258_s26] sm:$0x1] %v388_v12 }
  0x15   : > { %502 = vmatpush3.bf16.msra.mxu0 %v530_v3 }
  0x16   : > { %503 = vmatprep.subr.bf16.mxu0 %v545_v1 }
  0x19   : > { %504 = vmatpush3.bf16.msra.mxu0 %v531_v4 }
  0x1a   : > { %505 = vmatprep.subr.bf16.mxu0 %v545_v1 }
  0x1d   : > { %506 = vmatpush3.bf16.msra.mxu0 %v532_v5 }
  0x1e   : > { %507 = vmatprep.subr.bf16.mxu0 %v545_v1 }
  0x21   : > { %508 = vmatpush3.bf16.msra.mxu0 %v533_v6 }
  0x22   : > { %509 = vmatprep.subr.bf16.mxu0 %v545_v1 }
  0x25   : > { %510 = vmatpush3.bf16.msra.mxu0 %v534_v7 }
  0x26   : > { %511 = vmatprep.subr.bf16.mxu0 %v545_v1 }
  0x29   : > { %512 = vmatpush3.bf16.msra.mxu0 %v535_v8 }
  0x2c   : > { %514 = vmatmul.mubr.bf16.vlgmr.msra.gmra.mxu0 %v536_v9 }
  0xec   : > { %v373_v14 = vpop.f32.mrf.mxu0 }
  0xed   : > { %v374_v16 = vadd.f32 %v475_v13, %v373_v14 }
  0xee   : > { %v515_v17 = vpop.f32.mrf.mxu0 }
  0xef   : > { %v382_v18 = vadd.f32 %v380_v15, %v374_v16 }
  0xf0   : > { %v376_v19 = vpop.f32.mrf.mxu0 }
  0xf1   : > { %384 = vst [vmem:[%s258_s26 + $0x1] sm:$0xff] %v382_v18  ;;  %v377_v21 = vadd.f32 %v475_v13, %v376_v19 }
  0xf2   : > { %v516_v22 = vpop.f32.mrf.mxu0 }
  0xf3   : > { %v383_v23 = vadd.f32 %v381_v20, %v377_v21 }
  0xf5   : > { %385 = vst [vmem:[%s258_s26 + $0x9] sm:$0xff] %v383_v23 }
  0xf6 PF: > { %s15_s18 = sadd.s32 1, %s543_s18  }
  0xf7   : > { %p12_p4 = scmp.ge.s32.totalorder %s15_s18, 4  }
  0xf9   :  { %14 = sbr.rel (!%p12_p4) target bundleno = 1 (0x1), region = 76 }

</bundles_post_ra>
